<compile_context>
chip_gen: v5e
topology: v5e:2x2
jax: 0.10.0
libtpu: 0.0.40
codegen_flags: <defaults>
</compile_context>

<pallas_src>
import math

import jax
import jax.numpy as jnp
from jax.experimental import pallas as pl
from jax.experimental.pallas import tpu as pltpu


def _round_up(x, m):
    return ((x + m - 1) // m) * m


def timestep_embedding_kernel(x_ref, w1_ref, b1_ref, w2_ref, b2_ref, o_ref):
    # linear_1 in f32 (x kept f32; K = in_channels is tiny, so a full-precision
    # first matmul is essentially free and preserves timestep precision).
    h = jnp.dot(x_ref[...], w1_ref[...], preferred_element_type=jnp.float32)
    h = h + b1_ref[...]
    # SiLU(x) = x * sigmoid(x), strictly f32 (sigmoid -> EUP, mul -> VPU; safe
    # on v5e which has no bf16 VPU/EUP path).
    h = h * jax.nn.sigmoid(h)

    # linear_2: cast activations to the (bf16) weight dtype for the MXU,
    # accumulate in f32, add bias in f32, single cast at the store.
    out = jnp.dot(h.astype(w2_ref.dtype), w2_ref[...],
                  preferred_element_type=jnp.float32)
    o_ref[...] = (out + b2_ref[...]).astype(o_ref.dtype)


def timestep_embedding(sample, w1, b1, w2, b2, *, out_features=None, tm=None):
    """sample: [B, in_channels]; w1: [in_channels, D]; b1: [1, D];
    w2: [D, N]; b2: [1, N].  Weights are stored pre-transposed ([in, out]) so
    the kernel computes x @ W + b (== PyTorch's x @ W.T + b).  D and N are
    expected to already be lane-dense (padded to 128 at init time); if
    `out_features` is given and smaller than N the extra columns are sliced
    off.  Returns [B, out_features or N] in sample.dtype."""
    out_dtype = sample.dtype
    B, in_ch = sample.shape
    D = w1.shape[1]
    N = w2.shape[1]

    # --- Batch tile: fixed MXU-friendly TM (multiple of 16), grid via cdiv. ---
    if tm is None:
        tm = 256                       # good default for v6e/v7x; fine on v5e
    tm = max(16, (tm // 16) * 16)

    # Pad the batch at most to a multiple of 16 (x is narrow -> negligible copy)
    # so the row block is always sublane/bf16-pack friendly.
    B_pad = _round_up(B, 16)
    if B_pad != B:
        sample = jnp.pad(sample, ((0, B_pad - B), (0, 0)))
    tm = min(tm, B_pad)
    num_tiles = pl.cdiv(B_pad, tm)
    grid = (num_tiles,)

    # Megacore split only pays off with >= 2 full tiles per core; otherwise it
    # just duplicates the resident weights in each core's VMEM (v7x).
    semantics = ("parallel",) if num_tiles >= 4 else ("arbitrary",)

    # --- VMEM budget (weights resident + double-buffered x/out tiles). ---
    nbytes = lambda a: a.size * a.dtype.itemsize
    resident = nbytes(w1) + nbytes(b1) + nbytes(w2) + nbytes(b2)
    streamed = tm * (in_ch * sample.dtype.itemsize
                     + N * jnp.dtype(out_dtype).itemsize)
    need = 2 * resident + 2 * streamed + tm * (D + N) * 4   # + f32 temporaries
    compiler_kwargs = {}
    if need > (12 << 20):
        # TODO(synk): for very large D on v7x (64 MiB physical VMEM) stream W2
        # over an extra N grid axis instead of raising the limit further.
        compiler_kwargs["vmem_limit_bytes"] = min(int(need * 1.25), 48 << 20)

    bytes_accessed = (B_pad * in_ch * sample.dtype.itemsize
                      + resident
                      + B_pad * N * jnp.dtype(out_dtype).itemsize)
    cost = pl.CostEstimate(
        flops=2 * B_pad * (in_ch * D + D * N),
        transcendentals=B_pad * D,                 # one sigmoid per h element
        bytes_accessed=bytes_accessed)

    out = pl.pallas_call(
        timestep_embedding_kernel,
        out_shape=jax.ShapeDtypeStruct((B_pad, N), out_dtype),
        grid_spec=pltpu.PrefetchScalarGridSpec(
            num_scalar_prefetch=0,
            grid=grid,
            in_specs=[
                pl.BlockSpec((tm, in_ch), lambda i: (i, 0)),  # x: streamed, full (short) K
                pl.BlockSpec((in_ch, D), lambda i: (0, 0)),   # W1: VMEM-resident
                pl.BlockSpec((1, D), lambda i: (0, 0)),       # b1: VMEM-resident
                pl.BlockSpec((D, N), lambda i: (0, 0)),       # W2: VMEM-resident
                pl.BlockSpec((1, N), lambda i: (0, 0)),       # b2: VMEM-resident
            ],
            out_specs=pl.BlockSpec((tm, N), lambda i: (i, 0)),  # lane-dense out
        ),
        compiler_params=pltpu.CompilerParams(
            dimension_semantics=semantics, **compiler_kwargs),
        cost_estimate=cost,
    )(sample, w1, b1, w2, b2)

    if B_pad != B:
        out = out[:B]
    if out_features is not None and out_features != N:
        out = out[:, :out_features]
    return out


def init_params(key, in_channels, time_embed_dim, out_dim=None,
                w2_dtype=jnp.bfloat16):
    """nn.Linear-style U(-1/sqrt(fan_in), 1/sqrt(fan_in)) init, stored
    kernel-ready so the forward wrapper never touches the weights:
      - weights pre-transposed to [in, out],
      - hidden (D) and output (N) dims zero-padded to multiples of 128 here,
        at init time (exact: padded columns/rows are zero),
      - W2 (the dominant HBM term) stored in bf16; W1/biases stay f32 (W1 is
        tiny and keeping the first matmul in f32 preserves precision).
    Returns (w1, b1, w2, b2, out_features)."""
    out_dim = time_embed_dim if out_dim is None else out_dim
    D_pad = _round_up(time_embed_dim, 128)
    N_pad = _round_up(out_dim, 128)
    k1, k2, k3, k4 = jax.random.split(key, 4)
    lim1 = 1.0 / math.sqrt(in_channels)
    lim2 = 1.0 / math.sqrt(time_embed_dim)
    w1 = jax.random.uniform(k1, (in_channels, time_embed_dim), jnp.float32, -lim1, lim1)
    b1 = jax.random.uniform(k2, (1, time_embed_dim), jnp.float32, -lim1, lim1)
    w2 = jax.random.uniform(k3, (time_embed_dim, out_dim), jnp.float32, -lim2, lim2)
    b2 = jax.random.uniform(k4, (1, out_dim), jnp.float32, -lim2, lim2)
    w1 = jnp.pad(w1, ((0, 0), (0, D_pad - time_embed_dim)))
    b1 = jnp.pad(b1, ((0, 0), (0, D_pad - time_embed_dim)))
    w2 = jnp.pad(w2, ((0, D_pad - time_embed_dim), (0, N_pad - out_dim)))
    b2 = jnp.pad(b2, ((0, 0), (0, N_pad - out_dim)))
    return w1, b1, w2.astype(w2_dtype), b2, out_dim


if __name__ == "__main__":
    # Small shapes consistent with the module: batch=8, in_channels=32, D=128.
    B, in_channels, time_embed_dim = 8, 32, 128

    key = jax.random.PRNGKey(0)
    k_x, k_p = jax.random.split(key)
    sample = jax.random.normal(k_x, (B, in_channels), jnp.float32)
    w1, b1, w2, b2, out_features = init_params(k_p, in_channels, time_embed_dim)

    out = timestep_embedding(sample, w1, b1, w2, b2, out_features=out_features)
    out = jax.block_until_ready(out)
    assert out.shape == (B, out_features)
    assert out.dtype == sample.dtype

    # Reference 1: matches the kernel's numeric path (f32 first matmul,
    # bf16 operands / f32 accumulation for the second).
    h = jnp.dot(sample, w1, precision=jax.lax.Precision.HIGHEST) + b1
    h = h * jax.nn.sigmoid(h)
    ref_matched = jnp.dot(h.astype(jnp.bfloat16), w2,
                          preferred_element_type=jnp.float32) + b2
    ref_matched = ref_matched[:, :out_features]
    assert jnp.allclose(out, ref_matched.astype(out.dtype), atol=2e-2, rtol=2e-2)

    # Reference 2: full-f32 module semantics (tolerance loosened for the bf16
    # second matmul).
    h32 = jnp.dot(sample, w1, precision=jax.lax.Precision.HIGHEST) + b1
    h32 = h32 * jax.nn.sigmoid(h32)
    ref_f32 = jnp.dot(h32, w2.astype(jnp.float32),
                      precision=jax.lax.Precision.HIGHEST) + b2
    ref_f32 = ref_f32[:, :out_features]
    assert jnp.allclose(out, ref_f32, atol=5e-2, rtol=5e-2)

    # TODO(synk): cond_proj / post_act branches are None in the default config and are not emitted.
    print("KERNEL_OK")
</pallas_src>

<mosaic_0001>
module attributes {stable_mosaic.version = 11 : i64} {
  func.func @timestep_embedding_kernel(%arg0: i32, %arg1: memref<16x32xf32, #tpu.memory_space<vmem>>, %arg2: memref<32x128xf32, #tpu.memory_space<vmem>>, %arg3: memref<1x128xf32, #tpu.memory_space<vmem>>, %arg4: memref<128x128xbf16, #tpu.memory_space<vmem>>, %arg5: memref<1x128xf32, #tpu.memory_space<vmem>>, %arg6: memref<16x128xf32, #tpu.memory_space<vmem>>) attributes {dimension_semantics = [#tpu.dimension_semantics<arbitrary>], iteration_bounds = array<i64: 1>, scalar_prefetch = 0 : i64, scratch_operands = 0 : i64, tpu.core_type = #tpu.core_type<tc>, window_params = [{transform_indices = @transform_0, window_bounds = array<i64: 16, 32>}, {pipeline_mode = #tpu.pipeline_mode<synchronous>, transform_indices = @transform_1, window_bounds = array<i64: 32, 128>}, {pipeline_mode = #tpu.pipeline_mode<synchronous>, transform_indices = @transform_2, window_bounds = array<i64: 1, 128>}, {pipeline_mode = #tpu.pipeline_mode<synchronous>, transform_indices = @transform_3, window_bounds = array<i64: 128, 128>}, {pipeline_mode = #tpu.pipeline_mode<synchronous>, transform_indices = @transform_4, window_bounds = array<i64: 1, 128>}, {transform_indices = @transform_5, window_bounds = array<i64: 16, 128>}]} {
    %c0 = arith.constant 0 : index
    %c0_0 = arith.constant 0 : index
    %0 = vector.load %arg1[%c0, %c0_0] : memref<16x32xf32, #tpu.memory_space<vmem>>, vector<16x32xf32>
    %c0_1 = arith.constant 0 : index
    %c0_2 = arith.constant 0 : index
    %1 = vector.load %arg2[%c0_1, %c0_2] : memref<32x128xf32, #tpu.memory_space<vmem>>, vector<32x128xf32>
    %cst = arith.constant dense<0.000000e+00> : vector<16x128xf32>
    %2 = tpu.matmul %0, %1, %cst {dimension_numbers = #tpu.dot_dimension_numbers<[1], [0], [0], [1], [0, 0, 1, 1], [], []>} : vector<16x32xf32>, vector<32x128xf32>, vector<16x128xf32> -> vector<16x128xf32>
    %c0_3 = arith.constant 0 : index
    %c0_4 = arith.constant 0 : index
    %3 = vector.load %arg3[%c0_3, %c0_4] : memref<1x128xf32, #tpu.memory_space<vmem>>, vector<1x128xf32>
    %4 = vector.broadcast %3 : vector<1x128xf32> to vector<16x128xf32>
    %5 = arith.addf %2, %4 : vector<16x128xf32>
    %6 = arith.negf %5 : vector<16x128xf32>
    %7 = math.exp %6 : vector<16x128xf32>
    %cst_5 = arith.constant 1.000000e+00 : f32
    %8 = vector.broadcast %cst_5 : f32 to vector<16x128xf32>
    %9 = arith.addf %8, %7 : vector<16x128xf32>
    %10 = arith.divf %8, %9 : vector<16x128xf32>
    %11 = arith.mulf %5, %10 : vector<16x128xf32>
    %12 = arith.truncf %11 : vector<16x128xf32> to vector<16x128xbf16>
    %c0_6 = arith.constant 0 : index
    %c0_7 = arith.constant 0 : index
    %13 = vector.load %arg4[%c0_6, %c0_7] : memref<128x128xbf16, #tpu.memory_space<vmem>>, vector<128x128xbf16>
    %cst_8 = arith.constant dense<0.000000e+00> : vector<16x128xf32>
    %14 = tpu.matmul %12, %13, %cst_8 {dimension_numbers = #tpu.dot_dimension_numbers<[1], [0], [0], [1], [0, 0, 1, 1], [], []>} : vector<16x128xbf16>, vector<128x128xbf16>, vector<16x128xf32> -> vector<16x128xf32>
    %c0_9 = arith.constant 0 : index
    %c0_10 = arith.constant 0 : index
    %15 = vector.load %arg5[%c0_9, %c0_10] : memref<1x128xf32, #tpu.memory_space<vmem>>, vector<1x128xf32>
    %16 = vector.broadcast %15 : vector<1x128xf32> to vector<16x128xf32>
    %17 = arith.addf %14, %16 : vector<16x128xf32>
    %c0_11 = arith.constant 0 : index
    %c0_12 = arith.constant 0 : index
    %18 = vector.load %arg6[%c0_11, %c0_12] : memref<16x128xf32, #tpu.memory_space<vmem>>, vector<16x128xf32>
    tpu.vector_store %arg6[%c0_11, %c0_12], %17 {strides = array<i32>} : memref<16x128xf32, #tpu.memory_space<vmem>>, vector<16x128xf32>,
    return
  }
  func.func @transform_0(%arg0: i32) -> (i32, i32) {
    %c0_i32 = arith.constant 0 : i32
    %c0_i32_0 = arith.constant 0 : i32
    return %arg0, %c0_i32 : i32, i32
  }
  func.func @transform_1(%arg0: i32) -> (i32, i32) {
    %c0_i32 = arith.constant 0 : i32
    %c0_i32_0 = arith.constant 0 : i32
    %c0_i32_1 = arith.constant 0 : i32
    return %c0_i32, %c0_i32_0 : i32, i32
  }
  func.func @transform_2(%arg0: i32) -> (i32, i32) {
    %c0_i32 = arith.constant 0 : i32
    %c0_i32_0 = arith.constant 0 : i32
    %c0_i32_1 = arith.constant 0 : i32
    return %c0_i32, %c0_i32_0 : i32, i32
  }
  func.func @transform_3(%arg0: i32) -> (i32, i32) {
    %c0_i32 = arith.constant 0 : i32
    %c0_i32_0 = arith.constant 0 : i32
    %c0_i32_1 = arith.constant 0 : i32
    return %c0_i32, %c0_i32_0 : i32, i32
  }
  func.func @transform_4(%arg0: i32) -> (i32, i32) {
    %c0_i32 = arith.constant 0 : i32
    %c0_i32_0 = arith.constant 0 : i32
    %c0_i32_1 = arith.constant 0 : i32
    return %c0_i32, %c0_i32_0 : i32, i32
  }
  func.func @transform_5(%arg0: i32) -> (i32, i32) {
    %c0_i32 = arith.constant 0 : i32
    %c0_i32_0 = arith.constant 0 : i32
    return %arg0, %c0_i32 : i32, i32
  }
}

</mosaic_0001>

<bundles_post_ra>
// kernel: tpu_custom_call.1
= control target key start
LH: loop header
LB: loop body
LE: loop exit
PB: predicated region body
PF: predicated region fallthrough
CT: control target
= control target key end

     0   :  { %10 = vsyncpa [#allocation3], 0  ;;  %s482_s0 = inlined_call_operand.hbm [shape: f32[16,32], index: 0, kind: input, shape index: {}]   ;;  %s483_s1 = inlined_call_operand.hbm [shape: f32[32,128], index: 1, kind: input, shape index: {}]   ;;  %s484_s2 = inlined_call_operand.vmem [shape: f32[1,128], index: 2, kind: input, shape index: {}]   ;;  %s485_s3 = inlined_call_operand.hbm [shape: bf16[128,128], index: 3, kind: input, shape index: {}]   ;;  %s486_s4 = inlined_call_operand.vmem [shape: f32[1,128], index: 4, kind: input, shape index: {}]   ;;  %s487_s5 = inlined_call_operand.hbm [shape: f32[16,128], index: 5, kind: output, shape index: {}]  }
   0x1   :  { %11 = vsyncpa [#allocation6], 0 }
   0x2   :  { %12 = vsyncpa [#allocation4], 0  ;;  %s30_s20 = sshll.u32 %s483_s1, 4  ;;  %s417_s21 = smov [#allocation5]   ;;  %s31_s20 = int_to_ptr.hbm [resolvable:$true] %s30_s20 }
   0x3   :  { %s32_s22 = sshll.u32 %s417_s21, 4  ;;  %s17_s25 = sshll.u32 %s482_s0, 4  ;;  %s33_s22 = int_to_ptr.vmem [resolvable:$true] %s32_s22  ;;  %s18_s25 = int_to_ptr.hbm [resolvable:$true] %s17_s25 }
   0x4   :  { %s418_s26 = smov 128   ;;  %s419_s27 = smov 8  }
   0x5   :  { %38 = dma.hbm_to_vmem [thread:$0]  %s31_s20, 512, %s33_s22, [#allocation6], %s418_s26, %s418_s26, %s419_s27  }
   0x6   :  { %s420_s28 = smov [#allocation2]   ;;  %s45_s1 = sshll.u32 %s485_s3, 4  ;;  %s46_s1 = int_to_ptr.hbm [resolvable:$true] %s45_s1 }
   0x7   :  { %s19_s29 = sshll.u32 %s420_s28, 4  ;;  %s421_s0 = smov [#allocation7]   ;;  %s20_s29 = int_to_ptr.vmem [resolvable:$true] %s19_s29 }
   0x8   :  { %25 = dma.hbm_to_vmem [thread:$0]  %s18_s25, 256, %s20_s29, [#allocation3], %s418_s26, %s418_s26, %s419_s27  }
   0x9   :  { %s47_s7 = sshll.u32 %s421_s0, 4  ;;  %s422_s8 = smov 64   ;;  %s48_s7 = int_to_ptr.vmem [resolvable:$true] %s47_s7 }
   0xa   :  { %s423_s9 = smov 4  }
   0xb   :  { %53 = dma.hbm_to_vmem [thread:$0]  %s46_s1, 1024, %s48_s7, [#allocation6], %s422_s8, %s422_s8, %s423_s9  }
   0xc   :  { %411 = dma.done.wait [#allocation3], 256  }
   0xd   :  { %412 = vsyncadd [#allocation3], 4294967040 }
   0xe   :  { %413 = dma.done.wait [#allocation6], 1536  }
   0xf   :  { %414 = vsyncadd [#allocation6], 4294965760  ;;  %v73_v0 = vld [vmem:[#allocation5 + $0x18] sm:$0xff]  ;;  %v72_v1 = vld [vmem:[#allocation5 + $0x10] sm:$0xff]  ;;  %vm78_vm0 = vcmask 261120   ;;  %s424_s12 = smov [#allocation8]  }
  0x10   :  { %97 = vmatpush.msra.mxu0 %v73_v0  ;;  %v71_v2 = vld [vmem:[#allocation5 + $0x8] sm:$0xff]  ;;  %v70_v3 = vld [vmem:[#allocation5] sm:$0xff]  ;;  %v68_v4 = vld [vmem:[#allocation2] sm:$0xff]  ;;  %s237_s13 = sshll.u32 %s424_s12, 4  ;;  %s239_s16 = sshll.u32 %s487_s5, 4  ;;  %s238_s13 = int_to_ptr.vmem [resolvable:$true] %s237_s13  ;;  %s240_s16 = int_to_ptr.hbm [resolvable:$true] %s239_s16 }
  0x11   :  { %v69_v5 = vld [vmem:[#allocation2 + $0x8] sm:$0xff]  ;;  %v295_v7 = vld [vmem:[#allocation7 + $0x30] sm:$0xff]  ;;  %v294_v8 = vld [vmem:[#allocation7 + $0x28] sm:$0xff] }
  0x12   :  { %98 = vmatpush.msra.mxu0 %v72_v1  ;;  %v296_v6 = vld [vmem:[#allocation7 + $0x38] sm:$0xff]  ;;  %v293_v9 = vld [vmem:[#allocation7 + $0x20] sm:$0xff]  ;;  %v305_v11 = vld [vmem:[%s484_s2] ss:$0 sm:$0xff] }
  0x13   :  { %217 = vmatpush.bf16.msra.mxu1 %v296_v6  ;;  %v292_v10 = vld [vmem:[#allocation7 + $0x18] sm:$0xff]  ;;  %v291_v12 = vld [vmem:[#allocation7 + $0x10] sm:$0xff]  ;;  %v290_v15 = vld [vmem:[#allocation7 + $0x8] sm:$0xff] }
  0x14   :  { %99 = vmatpush.msra.mxu0 %v71_v2  ;;  %v289_v17 = vld [vmem:[#allocation7] sm:$0xff]  ;;  %v306_v48 = vld [vmem:[%s486_s4] ss:$0 sm:$0xff] }
  0x16   :  { %100 = vmatpush.msra.mxu0 %v70_v3 }
  0x17   :  { %253 = vmatmul.msk.f32.vlgmr.msra.gmra.mxu0 %vm78_vm0, %v68_v4  ;;  %218 = vmatpush.bf16.msra.mxu1 %v295_v7 }
  0x1b   :  { %219 = vmatpush.bf16.msra.mxu1 %v294_v8 }
  0x1f   :  { %254 = vmatmul.msk.f32.gmra.mxu0 %vm78_vm0, %v69_v5  ;;  %220 = vmatpush.bf16.msra.mxu1 %v293_v9 }
  0x23   :  { %221 = vmatpush.bf16.msra.mxu1 %v292_v10 }
  0x27   :  { %222 = vmatpush.bf16.msra.mxu1 %v291_v12 }
  0x2b   :  { %223 = vmatpush.bf16.msra.mxu1 %v290_v15 }
  0x2f   :  { %224 = vmatpush.bf16.msra.mxu1 %v289_v17 }
  0x94   :  { %v102_v13 = vpop.f32.mrf.mxu0 }
  0x95   :  { %v103_v14 = vadd.f32 %v305_v11, %v102_v13 }
  0x97   :  { %v255_v16 = vmul.f32 -1.442695, %v103_v14 }
  0x99   :  { %307 = vpow2.f32 %v255_v16 }
  0x9c   :  { %v105_v18 = vpop.f32.mrf.mxu0 }
  0x9d   :  { %v106_v19 = vadd.f32 %v305_v11, %v105_v18 }
  0x9f   :  { %v308_v20 = vpop.eup %307  ;;  %v256_v21 = vmul.f32 -1.442695, %v106_v19 }
  0xa0   :  { %v114_v22 = vadd.f32 1.0, %v308_v20 }
  0xa1   :  { %309 = vpow2.f32 %v256_v21 }
  0xa2   :  { %311 = vrcp.f32 %v114_v22  ;;  %v127_v32 = vand.u32 2147483648, %v114_v22  ;;  %vm121_vm2 = vweird.f32 %v114_v22  ;;  %v125_v33 = vand.u32 2147483647, %v114_v22 }
  0xa4   :  { %v128_v39 = vor.u32 1.1754944e-38, %v127_v32  ;;  %vm126_vm5 = vcmp.eq.f32.partialorder %v125_v33, 8.507059e+37 }
  0xa7   :  { %v310_v23 = vpop.eup %309 }
  0xa8   :  { %v312_v24 = vpop.eup %311  ;;  %v115_v25 = vadd.f32 1.0, %v310_v23 }
  0xa9   :  { %v117_v26 = vmul.f32 %v312_v24, %v114_v22  ;;  %vm122_vm1 = vweird.f32 %v312_v24 }
  0xaa   :  { %313 = vrcp.f32 %v115_v25  ;;  %vm123_vm3 = vmor %vm121_vm2, %vm122_vm1  ;;  %v142_v35 = vand.u32 2147483648, %v115_v25  ;;  %v140_v38 = vand.u32 2147483647, %v115_v25  ;;  %vm136_vm6 = vweird.f32 %v115_v25 }
  0xab   :  { %v118_v27 = vsub.f32 1.0, %v117_v26 }
  0xac   :  { %v143_v42 = vor.u32 1.1754944e-38, %v142_v35  ;;  %vm141_vm8 = vcmp.eq.f32.partialorder %v140_v38, 8.507059e+37 }
  0xad   :  { %v119_v28 = vmul.f32 %v312_v24, %v118_v27 }
  0xaf   :  { %v120_v30 = vadd.f32 %v312_v24, %v119_v28 }
  0xb0   :  { %v314_v29 = vpop.eup %313 }
  0xb1   :  { %v132_v31 = vmul.f32 %v314_v29, %v115_v25  ;;  %v124_v36 = vsel %vm123_vm3, %v312_v24, %v120_v30  ;;  %vm137_vm4 = vweird.f32 %v314_v29 }
  0xb2   :  { %v129_v41 = vsel %vm126_vm5, %v128_v39, %v124_v36  ;;  %vm138_vm7 = vmor %vm136_vm6, %vm137_vm4 }
  0xb3   :  { %v133_v34 = vsub.f32 1.0, %v132_v31  ;;  %v146_v45 = vmul.f32 %v129_v41, %v103_v14 }
  0xb5   :  { %v134_v37 = vmul.f32 %v314_v29, %v133_v34 }
  0xb7   :  { %v135_v40 = vadd.f32 %v314_v29, %v134_v37 }
  0xb9   :  { %v139_v43 = vsel %vm138_vm7, %v314_v29, %v135_v40 }
  0xba   :  { %v144_v44 = vsel %vm141_vm8, %v143_v42, %v139_v43 }
  0xbb   :  { %v147_v46 = vmul.f32 %v144_v44, %v106_v19 }
  0xbd   :  { %v148_v47 = vpack.c.bf16 %v147_v46, %v146_v45 }
  0xbf   :  { %225 = vmatmul.bf16.vlgmr.msra.gmra.mxu1 %v148_v47 }
 0x13c   :  { %v226_v49 = vpop.f32.mrf.mxu1 }
 0x13d   :  { %v227_v50 = vadd.f32 %v306_v48, %v226_v49 }
 0x13f   :  { %231 = vst [vmem:[#allocation8] sm:$0xff] %v227_v50 }
 0x144   :  { %v228_v51 = vpop.f32.mrf.mxu1 }
 0x145   :  { %v229_v52 = vadd.f32 %v306_v48, %v228_v51 }
 0x147   :  { %232 = vst [vmem:[#allocation8 + $0x8] sm:$0xff] %v229_v52 }
 0x148   :  { %245 = dma.vmem_to_hbm [thread:$0]  %s238_s13, 256, %s240_s16, [#allocation4], %s418_s26, %s418_s26, %s419_s27  }
 0x149   :  { %415 = dma.done.wait [#allocation4], 256  }
 0x14a   :  { %416 = vsyncadd [#allocation4], 4294967040 }
 0x14b   :  { %250 = vsyncpa [#allocation3], 1 }
 0x14c   :  { %251 = vsyncpa [#allocation6], 1 }
 0x14d   :  { %252 = vsyncpa [#allocation4], 1 }

</bundles_post_ra>
